<compile_context>
chip_gen: v7x
topology: tpu7x:2x2x1
jax: 0.10.0
libtpu: 0.0.40
codegen_flags: <defaults>
</compile_context>

<pallas_src>
import time

import jax
import jax.numpy as jnp
from jax.experimental import pallas as pl
from jax.experimental.pallas import tpu as pltpu


def make_qconv3x3_gemm(M, K, Cout, multiplier, out_zp):
    """Quantized 3x3 conv as a single im2col GEMM + requantize.

    Kernel inputs (im2col packing / zp subtraction / bf16 cast happen in the
    un-timed wrapper):
      xcol : (M, K)     bf16, K = 9*Cin, values = x_q - in_zp (pad taps = 0)
      wq   : (K, Cout)  bf16 holding qint8 values, tap-major (kh, kw, cin)
      bias : (1, Cout)  f32  = bias / out_scale
    Output: (M, Cout) uint8 (quantized representation, lane-contiguous).
    """
    # Two M-tiles: one per image at batch=2; also lets a v7x megacore shard.
    num_tiles = 2 if (M % 16 == 0 and (M // 2) % 8 == 0) else 1
    tile_m = M // num_tiles

    def kernel(x_ref, w_ref, b_ref, o_ref):
        acc = jnp.dot(x_ref[...], w_ref[...],
                      preferred_element_type=jnp.float32)
        # Requantize: y_q = clamp(round(acc*mult + bias/sy) + zy, 0, 255)
        y = acc * jnp.float32(multiplier) + b_ref[...]
        y = jnp.clip(jnp.round(y) + jnp.float32(out_zp), 0.0, 255.0)
        o_ref[...] = y.astype(jnp.uint8)

    cost = pl.CostEstimate(
        flops=2 * M * K * Cout,
        transcendentals=0,
        bytes_accessed=M * K * 2 + K * Cout * 2 + Cout * 4 + M * Cout,
    )

    conv = pl.pallas_call(
        kernel,
        out_shape=jax.ShapeDtypeStruct((M, Cout), jnp.uint8),
        grid=(num_tiles,),
        in_specs=[
            pl.BlockSpec((tile_m, K), lambda i: (i, 0)),
            pl.BlockSpec((K, Cout), lambda i: (0, 0)),
            pl.BlockSpec((1, Cout), lambda i: (0, 0)),
        ],
        out_specs=pl.BlockSpec((tile_m, Cout), lambda i: (i, 0)),
        compiler_params=pltpu.CompilerParams(
            dimension_semantics=("parallel",)),
        cost_estimate=cost,
    )
    return conv


def quantize_per_tensor(x, scale, zero_point):
    """torch.quantize_per_tensor -> quint8 values stored as float32."""
    q = jnp.round(x / jnp.float32(scale)) + jnp.float32(zero_point)
    return jnp.clip(q, 0.0, 255.0)


def reference_qconv(xq_nchw, w_q, bias, multiplier, in_zp, out_scale, out_zp):
    """Pure-JAX reference of the quantized conv (for correctness checking)."""
    x = jnp.transpose(xq_nchw, (0, 2, 3, 1)) - jnp.float32(in_zp)   # NHWC
    acc = jax.lax.conv_general_dilated(
        x, w_q, window_strides=(1, 1), padding="SAME",
        dimension_numbers=("NHWC", "HWIO", "NHWC"),
        precision=jax.lax.Precision.HIGHEST)
    y = acc * jnp.float32(multiplier) + bias / jnp.float32(out_scale)
    y = jnp.clip(jnp.round(y) + jnp.float32(out_zp), 0.0, 255.0)
    return y.astype(jnp.uint8)


class VGG19:
    IN_SCALE = 0.0472
    IN_ZP = 64
    OUT_SCALE = 1.0    # nnq.Conv2d default output scale
    OUT_ZP = 0         # nnq.Conv2d default output zero_point

    def __init__(self, batch_size=2):
        # Channel structure matches the PyTorch module; spatial sizes reduced
        # (224->16, 112->8, 56->4) to keep the demo small.
        # (idx) -> (B, Cin, H, W) of the quantized input x{idx}
        self.shapes = {
            2:  (batch_size, 64, 16, 16),    # orig x2  = [B, 64, 224, 224]
            5:  (batch_size, 64, 8, 8),      # orig x5  = [B, 64, 112, 112]
            7:  (batch_size, 128, 8, 8),     # orig x7  = [B, 128, 112, 112]
            12: (batch_size, 256, 4, 4),     # orig x12 = [B, 256, 56, 56]
        }
        self.out_channels = {2: 64, 5: 128, 7: 128, 12: 256}
        self.time = {}
        self.params = {}
        self.ref_params = {}
        self.ops = {}

        root = jax.random.PRNGKey(0)
        for idx, (b, cin, h, w) in self.shapes.items():
            cout = self.out_channels[idx]
            kw_key, kb_key = jax.random.split(jax.random.fold_in(root, idx))
            # Deterministic synthetic weights, quantized symmetrically to qint8.
            w_f = jax.random.normal(kw_key, (3, 3, cin, cout), jnp.float32) * 0.05
            w_scale = float(jnp.max(jnp.abs(w_f)) / 127.0)
            w_q = jnp.clip(jnp.round(w_f / w_scale), -127.0, 127.0)   # f32 ints
            bias = jax.random.normal(kb_key, (1, cout), jnp.float32) * 0.1
            multiplier = self.IN_SCALE * w_scale / self.OUT_SCALE
            bias_adj = bias / self.OUT_SCALE                          # (1, Cout)

            M = b * h * w
            K = 9 * cin
            conv = make_qconv3x3_gemm(M, K, cout, multiplier, self.OUT_ZP)
            self.ops[idx] = jax.jit(conv)
            self.params[idx] = (
                # (3,3,Cin,Cout) -> (9*Cin, Cout), tap-major, exact in bf16.
                w_q.reshape(K, cout).astype(jnp.bfloat16),
                bias_adj.astype(jnp.float32),
            )
            self.ref_params[idx] = (w_q, bias, multiplier)

    def _make_input(self, idx):
        b, cin, h, w = self.shapes[idx]
        key = jax.random.fold_in(jax.random.PRNGKey(0), 100 + idx)
        x = jax.random.uniform(key, (b, cin, h, w), jnp.float32)  # torch.rand analogue
        xq = quantize_per_tensor(x, self.IN_SCALE, self.IN_ZP)    # NCHW quint8 values
        # Un-timed im2col packing:
        #   NCHW -> NHWC, subtract the input zero-point (padding becomes a
        #   true 0, matching fbgemm), pad spatially, gather the 9 taps into
        #   the channel axis -> (B*H*W, 9*Cin), bf16 (exact: ints in [-64,191]).
        xc = jnp.transpose(xq, (0, 2, 3, 1)) - jnp.float32(self.IN_ZP)
        xpad = jnp.pad(xc, ((0, 0), (1, 1), (1, 1), (0, 0)))
        taps = [xpad[:, kh:kh + h, kw:kw + w, :]
                for kh in range(3) for kw in range(3)]
        xcol = jnp.concatenate(taps, axis=-1)                     # (B,H,W,9*Cin)
        xcol = xcol.reshape(b * h * w, 9 * cin).astype(jnp.bfloat16)
        return xcol, xq

    def forward(self, i):
        last_out = None
        while True:
            if i in self.ops:
                xcol, self.last_xq = self._make_input(i)
                op = self.ops[i]
                wq, bq = self.params[i]
                jax.block_until_ready((xcol, wq, bq))
                for _ in range(5):                    # warm-up, like the torch loop
                    jax.block_until_ready(op(xcol, wq, bq))
                start = time.time()
                last_out = jax.block_until_ready(op(xcol, wq, bq))
                stop = time.time()
                self.time['OP{}'.format(i)] = stop - start
                i = i + 1
            else:
                self.last_out = last_out
                return i


if __name__ == "__main__":
    model = VGG19(batch_size=2)
    for start in (2, 5, 7, 12):
        nxt = model.forward(start)
        assert nxt == start + 1, (start, nxt)
        out = model.last_out
        b, cin, h, w = model.shapes[start]
        cout = model.out_channels[start]
        assert out is not None and out.dtype == jnp.uint8
        assert out.shape == (b * h * w, cout), out.shape
        # Correctness vs a pure-JAX quantized-conv reference (<= 1 quant step).
        w_q, bias, multiplier = model.ref_params[start]
        ref = reference_qconv(model.last_xq, w_q, bias, multiplier,
                              model.IN_ZP, model.OUT_SCALE, model.OUT_ZP)
        out_nhwc = out.reshape(b, h, w, cout)
        diff = int(jnp.max(jnp.abs(out_nhwc.astype(jnp.int32)
                                   - ref.astype(jnp.int32))))
        assert diff <= 1, ("quantized-conv mismatch", start, diff)
    jax.block_until_ready(model.last_out)
    print("KERNEL_OK")
</pallas_src>

<mosaic_0001>
module attributes {stable_mosaic.version = 11 : i64} {
  func.func @kernel(%arg0: i32, %arg1: memref<256x576xbf16, #tpu.memory_space<vmem>>, %arg2: memref<576x64xbf16, #tpu.memory_space<vmem>>, %arg3: memref<1x64xf32, #tpu.memory_space<vmem>>, %arg4: memref<256x64xi8, #tpu.memory_space<vmem>>) attributes {dimension_semantics = [#tpu.dimension_semantics<parallel>], iteration_bounds = array<i64: 2>, scalar_prefetch = 0 : i64, scratch_operands = 0 : i64, tpu.core_type = #tpu.core_type<tc>, window_params = [{transform_indices = @transform_0, window_bounds = array<i64: 256, 576>}, {pipeline_mode = #tpu.pipeline_mode<synchronous>, transform_indices = @transform_1, window_bounds = array<i64: 576, 64>}, {pipeline_mode = #tpu.pipeline_mode<synchronous>, transform_indices = @transform_2, window_bounds = array<i64: 1, 64>}, {transform_indices = @transform_3, window_bounds = array<i64: 256, 64>}]} {
    %c0 = arith.constant 0 : index
    %c0_0 = arith.constant 0 : index
    %0 = vector.load %arg1[%c0, %c0_0] : memref<256x576xbf16, #tpu.memory_space<vmem>>, vector<256x576xbf16>
    %c0_1 = arith.constant 0 : index
    %c0_2 = arith.constant 0 : index
    %1 = vector.load %arg2[%c0_1, %c0_2] : memref<576x64xbf16, #tpu.memory_space<vmem>>, vector<576x64xbf16>
    %cst = arith.constant dense<0.000000e+00> : vector<256x64xf32>
    %2 = tpu.matmul %0, %1, %cst {dimension_numbers = #tpu.dot_dimension_numbers<[1], [0], [0], [1], [0, 0, 1, 1], [], []>} : vector<256x576xbf16>, vector<576x64xbf16>, vector<256x64xf32> -> vector<256x64xf32>
    %cst_3 = arith.constant 7.46816731E-5 : f32
    %3 = vector.broadcast %cst_3 : f32 to vector<256x64xf32>
    %4 = arith.mulf %2, %3 : vector<256x64xf32>
    %c0_4 = arith.constant 0 : index
    %c0_5 = arith.constant 0 : index
    %5 = vector.load %arg3[%c0_4, %c0_5] : memref<1x64xf32, #tpu.memory_space<vmem>>, vector<1x64xf32>
    %6 = vector.broadcast %5 : vector<1x64xf32> to vector<256x64xf32>
    %7 = arith.addf %4, %6 : vector<256x64xf32>
    %8 = math.roundeven %7 : vector<256x64xf32>
    %cst_6 = arith.constant 0.000000e+00 : f32
    %9 = vector.broadcast %cst_6 : f32 to vector<256x64xf32>
    %10 = arith.addf %8, %9 : vector<256x64xf32>
    %cst_7 = arith.constant 0.000000e+00 : f32
    %cst_8 = arith.constant 2.550000e+02 : f32
    %11 = vector.broadcast %cst_7 : f32 to vector<256x64xf32>
    %12 = arith.maximumf %11, %10 : vector<256x64xf32>
    %13 = vector.broadcast %cst_8 : f32 to vector<256x64xf32>
    %14 = arith.minimumf %13, %12 : vector<256x64xf32>
    %15 = arith.fptoui %14 : vector<256x64xf32> to vector<256x64xi8>
    %c0_9 = arith.constant 0 : index
    %c0_10 = arith.constant 0 : index
    %16 = vector.load %arg4[%c0_9, %c0_10] : memref<256x64xi8, #tpu.memory_space<vmem>>, vector<256x64xi8>
    tpu.vector_store %arg4[%c0_9, %c0_10], %15 {strides = array<i32>} : memref<256x64xi8, #tpu.memory_space<vmem>>, vector<256x64xi8>,
    return
  }
  func.func @transform_0(%arg0: i32) -> (i32, i32) {
    %c0_i32 = arith.constant 0 : i32
    %c0_i32_0 = arith.constant 0 : i32
    return %arg0, %c0_i32 : i32, i32
  }
  func.func @transform_1(%arg0: i32) -> (i32, i32) {
    %c0_i32 = arith.constant 0 : i32
    %c0_i32_0 = arith.constant 0 : i32
    %c0_i32_1 = arith.constant 0 : i32
    return %c0_i32, %c0_i32_0 : i32, i32
  }
  func.func @transform_2(%arg0: i32) -> (i32, i32) {
    %c0_i32 = arith.constant 0 : i32
    %c0_i32_0 = arith.constant 0 : i32
    %c0_i32_1 = arith.constant 0 : i32
    return %c0_i32, %c0_i32_0 : i32, i32
  }
  func.func @transform_3(%arg0: i32) -> (i32, i32) {
    %c0_i32 = arith.constant 0 : i32
    %c0_i32_0 = arith.constant 0 : i32
    return %arg0, %c0_i32 : i32, i32
  }
}

</mosaic_0001>

<bundles_post_ra>
// kernel: tpu_custom_call.1
= control target key start
LH: loop header
LB: loop body
LE: loop exit
PB: predicated region body
PF: predicated region fallthrough
CT: control target
= control target key end

     0   :  { %s2530_s12 = smov 0   ;;  %s2939_s0 = inlined_call_operand.vmem [shape: bf16[512,576], index: 0, kind: input, shape index: {}]   ;;  %s2940_s1 = inlined_call_operand.vmem [shape: bf16[576,64], index: 1, kind: input, shape index: {}]   ;;  %s2941_s2 = inlined_call_operand.vmem [shape: f32[1,64], index: 2, kind: input, shape index: {}]   ;;  %s2942_s3 = inlined_call_operand.vmem [shape: u8[512,64], index: 3, kind: output, shape index: {}]  }
   0x1 LB: > { %s1869_s13 = sadd.s32 4294967295, %s2508_s12   ;;  %p1873_p0 = scmp.ge.s32.totalorder %s2508_s12, 1  ;;  %s2508_s12 = sphi %s2530_s12, %s13_s12  }
   0x2   : > { %p139_p1 = scmp.lt.s32.totalorder %s2508_s12, 3 }
   0x4   : > { %p140_p2 = pnand %p1873_p0, %p139_p1 }
   0x5   : > { %v2354_v0 = vld [vmem:[%s2940_s1 + $0x40] sm:$0xff] (!%p140_p2)   ;;  %s1874_s16 = sshll.u32 (!%p140_p2), %s1869_s13, 5  ;;  %v2356_v2 = vld [vmem:[%s2940_s1 + $0x48] sm:$0xff] (!%p140_p2)   ;;  %v2358_v4 = vld [vmem:[%s2940_s1 + $0x50] sm:$0xff] (!%p140_p2)   ;;  %vm962_vm0 = vcmask (!%p140_p2), 523264   ;;  %s1876_s19 = sshll.u32 (!%p140_p2), %s1869_s13, 3 }
   0x6   : > { %143 = sbr.rel (%p140_p2) target bundleno = 430 (0x1ae), region = 32  ;;  %v2355_v1 = vld [vmem:[%s2940_s1] sm:$0xff] (!%p140_p2)   ;;  %2013 = vmatprep.subr.bf16.mxu0 (!%p140_p2), %v2354_v0  ;;  %2297 = vmatprep.subr.bf16.mxu1 (!%p140_p2), %v2354_v0  ;;  %p165_p3 = scmp.lt.s32.totalorder (!%p140_p2), %s1874_s16, 63  ;;  %v2357_v3 = vld [vmem:[%s2940_s1 + $0x8] sm:$0xff] (!%p140_p2)   ;;  %v2359_v5 = vld [vmem:[%s2940_s1 + $0x10] sm:$0xff] (!%p140_p2)  }
   0x7   : > { %2014 = vmatpush3.bf16.msra.mxu0 (!%p140_p2), %v2355_v1  ;;  %2305 = vmatpush3.bf16.msra.mxu1 (!%p140_p2), %v2355_v1  ;;  %v2360_v6 = vld [vmem:[%s2940_s1 + $0x58] sm:$0xff] (!%p140_p2)   ;;  %v2362_v8 = vld [vmem:[%s2940_s1 + $0x60] sm:$0xff] (!%p140_p2)   ;;  %v2364_v10 = vld [vmem:[%s2940_s1 + $0x68] sm:$0xff] (!%p140_p2)   ;;  %p172_p4 = scmp.lt.s32.totalorder (!%p140_p2), %s1876_s19, 15 }
   0x8   : > { %2015 = vmatprep.subr.bf16.mxu0 (!%p140_p2), %v2356_v2  ;;  %2298 = vmatprep.subr.bf16.mxu1 (!%p140_p2), %v2356_v2  ;;  %v2361_v7 = vld [vmem:[%s2940_s1 + $0x18] sm:$0xff] (!%p140_p2)   ;;  %v2363_v9 = vld [vmem:[%s2940_s1 + $0x20] sm:$0xff] (!%p140_p2)   ;;  %v2365_v13 = vld [vmem:[%s2940_s1 + $0x28] sm:$0xff] (!%p140_p2)  }
   0x9   : > { %v2366_v14 = vld [vmem:[%s2940_s1 + $0x70] sm:$0xff] (!%p140_p2)   ;;  %v2368_v16 = vld [vmem:[%s2940_s1 + $0x78] sm:$0xff] (!%p140_p2)   ;;  %v2376_v18 = vld [vmem:[%s2940_s1 + $0xc0] sm:$0xff] (!%p140_p2)  }
   0xa   : > { %v2367_v15 = vld [vmem:[%s2940_s1 + $0x30] sm:$0xff] (!%p140_p2)   ;;  %v2369_v17 = vld [vmem:[%s2940_s1 + $0x38] sm:$0xff] (!%p140_p2)   ;;  %v2379_v19 = vld [vmem:[%s2940_s1 + $0x100] sm:$0xff] (!%p140_p2)  }
   0xb   : > { %2016 = vmatpush3.bf16.msra.mxu0 (!%p140_p2), %v2357_v3  ;;  %2306 = vmatpush3.bf16.msra.mxu1 (!%p140_p2), %v2357_v3  ;;  %v2377_v22 = vld [vmem:[%s2940_s1 + $0x80] sm:$0xff] (!%p140_p2)   ;;  %v2378_v23 = vld [vmem:[%s2940_s1 + $0xc8] sm:$0xff] (!%p140_p2)   ;;  %v2387_v28 = vld [vmem:[%s2940_s1 + $0xd0] sm:$0xff] (!%p140_p2)  }
   0xc   : > { %2017 = vmatprep.subr.bf16.mxu0 (!%p140_p2), %v2358_v4  ;;  %2299 = vmatprep.subr.bf16.mxu1 (!%p140_p2), %v2358_v4  ;;  %v2380_v26 = vld [vmem:[%s2940_s1 + $0x88] sm:$0xff] (!%p140_p2)   ;;  %v2388_v30 = vld [vmem:[%s2940_s1 + $0x90] sm:$0xff] (!%p140_p2)   ;;  %v2389_v31 = vld [vmem:[%s2940_s1 + $0xd8] sm:$0xff] (!%p140_p2)  }
   0xd   : > { %s2944_s16 = smov (!%p165_p3, %s1874_s16), 63  ;;  %v2390_v34 = vld [vmem:[%s2940_s1 + $0x98] sm:$0xff]   ;;  %v2410_v35 = vld [vmem:[%s2940_s1 + $0x108] sm:$0xff]   ;;  %v2397_v37 = vld [vmem:[%s2940_s1 + $0xe0] sm:$0xff]   ;;  %s2946_s19 = smov (!%p172_p4, %s1876_s19), 15 }
   0xe   : > { %s2313_s29 = smul.u32 20, %s2944_s16  ;;  %v2398_v39 = vld [vmem:[%s2940_s1 + $0xa0] sm:$0xff]   ;;  %v2399_v40 = vld [vmem:[%s2940_s1 + $0xe8] sm:$0xff]   ;;  %v2407_v46 = vld [vmem:[%s2940_s1 + $0xf0] sm:$0xff]   ;;  %s1877_s13 = sshll.u32 %s2946_s19, 3 }
   0xf   : > { %2018 = vmatpush3.bf16.msra.mxu0 %v2359_v5  ;;  %2307 = vmatpush3.bf16.msra.mxu1 %v2359_v5  ;;  %v2400_v43 = vld [vmem:[%s2940_s1 + $0xa8] sm:$0xff]   ;;  %v2430_v47 = vld [vmem:[%s2940_s1 + $0x110] sm:$0xff]   ;;  %v2409_v49 = vld [vmem:[%s2940_s1 + $0xf8] sm:$0xff]   ;;  %s2856_s22 = scalar_lea.vmem %s2942_s3, %s1877_s13 }
  0x10   : > { %2019 = vmatprep.subr.bf16.mxu0 %v2360_v6  ;;  %2300 = vmatprep.subr.bf16.mxu1 %v2360_v6  ;;  %s2570_s9 = scalar_lea.vmem %s2939_s0, %s2313_s29  ;;  %v2408_v48 = vld [vmem:[%s2940_s1 + $0xb0] sm:$0xff]   ;;  %v2411_v52 = vld [vmem:[%s2940_s1 + $0xb8] sm:$0xff]  }
  0x11   : > { %v2372_v11 = vld [vmem:[%s2570_s9 + $0x4] ss:$20 sps:$4 sm:$0xff]   ;;  %v2370_v20 = vld [vmem:[%s2570_s9] ss:$20 sps:$4 sm:$0xff]   ;;  %v2385_v27 = vld [vmem:[%s2570_s9 + $0x28] ss:$20 sps:$4 sm:$0xff]  }
  0x12   : > { %v2375_v12 = vld [vmem:[%s2570_s9 + $0x1e4] ss:$20 sps:$4 sm:$0xff]   ;;  %1043 = vmatprep.mubr.bf16.mxu0 %v2372_v11  ;;  %v2373_v21 = vld [vmem:[%s2570_s9 + $0x1e0] ss:$20 sps:$4 sm:$0xff]   ;;  %v2386_v29 = vld [vmem:[%s2570_s9 + $0x208] ss:$20 sps:$4 sm:$0xff]  }
  0x13   : > { %2020 = vmatpush3.bf16.msra.mxu0 %v2361_v7  ;;  %2308 = vmatpush3.bf16.msra.mxu1 %v2361_v7  ;;  %v2381_v24 = vld [vmem:[%s2570_s9 + $0x2c] ss:$20 sps:$4 sm:$0xff]   ;;  %v2391_v32 = vld [vmem:[%s2570_s9 + $0x54] ss:$20 sps:$4 sm:$0xff]   ;;  %v2395_v36 = vld [vmem:[%s2570_s9 + $0x50] ss:$20 sps:$4 sm:$0xff]  }
  0x14   : > { %2021 = vmatprep.subr.bf16.mxu0 %v2362_v8  ;;  %2301 = vmatprep.subr.bf16.mxu1 %v2362_v8  ;;  %v2383_v25 = vld [vmem:[%s2570_s9 + $0x20c] ss:$20 sps:$4 sm:$0xff]   ;;  %v2393_v33 = vld [vmem:[%s2570_s9 + $0x234] ss:$20 sps:$4 sm:$0xff]   ;;  %v2396_v38 = vld [vmem:[%s2570_s9 + $0x230] ss:$20 sps:$4 sm:$0xff]  }
  0x15   : > { %1139 = vmatprep.mubr.bf16.mxu1 %v2375_v12  ;;  %v2401_v41 = vld [vmem:[%s2570_s9 + $0x7c] ss:$20 sps:$4 sm:$0xff]   ;;  %v2405_v44 = vld [vmem:[%s2570_s9 + $0x78] ss:$20 sps:$4 sm:$0xff]   ;;  %v2417_v54 = vld [vmem:[%s2570_s9 + $0xa0] ss:$20 sps:$4 sm:$0xff]  }
  0x16   : > { %v2403_v42 = vld [vmem:[%s2570_s9 + $0x25c] ss:$20 sps:$4 sm:$0xff]   ;;  %v2406_v45 = vld [vmem:[%s2570_s9 + $0x258] ss:$20 sps:$4 sm:$0xff]   ;;  %v2420_v57 = vld [vmem:[%s2570_s9 + $0x34] ss:$20 sps:$4 sm:$0xff]  }
  0x17   : > { %2022 = vmatpush3.bf16.msra.mxu0 %v2363_v9  ;;  %2309 = vmatpush3.bf16.msra.mxu1 %v2363_v9  ;;  %v2412_v50 = vld [vmem:[%s2570_s9 + $0xa4] ss:$20 sps:$4 sm:$0xff]   ;;  %v2416_v51 = vld [vmem:[%s2570_s9 + $0xc] ss:$20 sps:$4 sm:$0xff]   ;;  %v2414_v53 = vld [vmem:[%s2570_s9 + $0x8] ss:$20 sps:$4 sm:$0xff]  }
  0x18   : > { %2023 = vmatprep.subr.bf16.mxu0 %v2364_v10  ;;  %2302 = vmatprep.subr.bf16.mxu1 %v2364_v10  ;;  %v2418_v55 = vld [vmem:[%s2570_s9 + $0xcc] ss:$20 sps:$4 sm:$0xff]   ;;  %v2449_v56 = vld [vmem:[%s2940_s1 + $0x118] sm:$0xff]   ;;  %v2423_v59 = vld [vmem:[%s2570_s9 + $0x30] ss:$20 sps:$4 sm:$0xff]  }
  0x19   : > { %v2422_v58 = vld [vmem:[%s2570_s9 + $0xc8] ss:$20 sps:$4 sm:$0xff]   ;;  %v2428_v62 = vld [vmem:[%s2570_s9 + $0xf0] ss:$20 sps:$4 sm:$0xff]   ;;  %v2429_v63 = vld [vmem:[%s2570_s9 + $0x58] ss:$20 sps:$4 sm:$0xff]  }
  0x1a   : > { %v2424_v60 = vld [vmem:[%s2570_s9 + $0xf4] ss:$20 sps:$4 sm:$0xff]   ;;  %v2426_v61 = vld [vmem:[%s2570_s9 + $0x5c] ss:$20 sps:$4 sm:$0xff]   ;;  %v2433_v1 = vld [vmem:[%s2570_s9 + $0x84] ss:$20 sps:$4 sm:$0xff]  }
  0x1b   : > { %2024 = vmatpush3.bf16.msra.mxu0 %v2365_v13  ;;  %2310 = vmatpush3.bf16.msra.mxu1 %v2365_v13  ;;  %v2431_v0 = vld [vmem:[%s2570_s9 + $0x11c] ss:$20 sps:$4 sm:$0xff]   ;;  %v2435_v2 = vld [vmem:[%s2570_s9 + $0x118] ss:$20 sps:$4 sm:$0xff]   ;;  %v2436_v3 = vld [vmem:[%s2570_s9 + $0x80] ss:$20 sps:$4 sm:$0xff]  }
  0x1c   : > { %2025 = vmatprep.subr.bf16.mxu0 %v2366_v14  ;;  %2303 = vmatprep.subr.bf16.mxu1 %v2366_v14  ;;  %v2437_v4 = vld [vmem:[%s2570_s9 + $0x144] ss:$20 sps:$4 sm:$0xff]   ;;  %v2439_v5 = vld [vmem:[%s2570_s9 + $0xac] ss:$20 sps:$4 sm:$0xff]   ;;  %v2442_v7 = vld [vmem:[%s2570_s9 + $0xa8] ss:$20 sps:$4 sm:$0xff]  }
  0x1d   : > { %v2441_v6 = vld [vmem:[%s2570_s9 + $0x140] ss:$20 sps:$4 sm:$0xff]   ;;  %v2447_v10 = vld [vmem:[%s2570_s9 + $0x168] ss:$20 sps:$4 sm:$0xff]   ;;  %v2448_v11 = vld [vmem:[%s2570_s9 + $0xd0] ss:$20 sps:$4 sm:$0xff]  }
  0x1e   : > { %v2443_v8 = vld [vmem:[%s2570_s9 + $0x16c] ss:$20 sps:$4 sm:$0xff]   ;;  %v2445_v9 = vld [vmem:[%s2570_s9 + $0xd4] ss:$20 sps:$4 sm:$0xff]   ;;  %v2452_v13 = vld [vmem:[%s2570_s9 + $0xfc] ss:$20 sps:$4 sm:$0xff]  }
  0x1f   : > { %2026 = vmatpush3.bf16.msra.mxu0 %v2367_v15  ;;  %2311 = vmatpush3.bf16.msra.mxu1 %v2367_v15  ;;  %v2450_v12 = vld [vmem:[%s2570_s9 + $0x194] ss:$20 sps:$4 sm:$0xff]   ;;  %v2454_v14 = vld [vmem:[%s2570_s9 + $0x190] ss:$20 sps:$4 sm:$0xff]   ;;  %v2455_v15 = vld [vmem:[%s2570_s9 + $0xf8] ss:$20 sps:$4 sm:$0xff]  }
  0x20   : > { %2027 = vmatprep.subr.bf16.mxu0 %v2368_v16  ;;  %2304 = vmatprep.subr.bf16.mxu1 %v2368_v16  ;;  %v2456_v16 = vld [vmem:[%s2570_s9 + $0x1bc] ss:$20 sps:$4 sm:$0xff]  }
  0x23   : > { %2028 = vmatpush3.bf16.msra.mxu0 %v2369_v17  ;;  %2312 = vmatpush3.bf16.msra.mxu1 %v2369_v17  ;;  %v2458_v17 = vld [vmem:[%s2570_s9 + $0x124] ss:$20 sps:$4 sm:$0xff]  }
  0x24   : > { %2125 = vmatprep.subr.bf16.mxu1 %v2376_v18  ;;  %2257 = vmatprep.subr.bf16.mxu0 %v2379_v19  ;;  %v2460_v18 = vld [vmem:[%s2570_s9 + $0x1b8] ss:$20 sps:$4 sm:$0xff]  }
  0x26   : > { %1044 = vmatmul.mubr.bf16.vlgmr.msra.gmra.mrb[0].mxu0 %v2370_v20  ;;  %1140 = vmatmul.mubr.bf16.vlgmr.msra.gmra.mrb[0].mxu1 %v2373_v21  ;;  %v2462_v20 = vld [vmem:[%s2570_s9 + $0x14c] ss:$20 sps:$4 sm:$0xff]   ;;  %v2464_v21 = vld [vmem:[%s2570_s9 + $0x10] ss:$20 sps:$4 sm:$0xff]  }
  0x27   : > { %2126 = vmatpush3.bf16.msra.mxu1 %v2377_v22  ;;  %2258 = vmatpush3.bf16.msra.mxu0 %v2379_v19  ;;  %v2461_v19 = vld [vmem:[%s2570_s9 + $0x120] ss:$20 sps:$4 sm:$0xff]   ;;  %v2465_v22 = vld [vmem:[%s2570_s9 + $0x148] ss:$20 sps:$4 sm:$0xff]  }
  0x28   : > { %2127 = vmatprep.subr.bf16.mxu1 %v2378_v23  ;;  %1051 = vmatprep.mubr.bf16.mxu0 %v2381_v24  ;;  %v2466_v23 = vld [vmem:[%s2570_s9 + $0x38] ss:$20 sps:$4 sm:$0xff]   ;;  %v2467_v24 = vld [vmem:[%s2570_s9 + $0x174] ss:$20 sps:$4 sm:$0xff]  }
  0x29   : > { %1147 = vmatprep.mubr.bf16.mxu1 %v2383_v25  ;;  %2259 = vmatprep.subr.bf16.mxu0 %v2410_v35  ;;  %v2469_v25 = vld [vmem:[%s2570_s9 + $0x60] ss:$20 sps:$4 sm:$0xff]  }
  0x2b   : > { %2128 = vmatpush3.bf16.msra.mxu1 %v2380_v26  ;;  %2260 = vmatpush3.bf16.msra.mxu0 %v2410_v35  ;;  %v2470_v26 = vld [vmem:[%s2570_s9 + $0x170] ss:$20 sps:$4 sm:$0xff]   ;;  %v2481_v35 = vld [vmem:[%s2570_s9 + $0x128] ss:$20 sps:$4 sm:$0xff]  }
  0x2c   : > { %2129 = vmatprep.subr.bf16.mxu1 %v2387_v28  ;;  %2261 = vmatprep.subr.bf16.mxu0 %v2430_v47  ;;  %v2472_v28 = vld [vmem:[%s2570_s9 + $0x19c] ss:$20 sps:$4 sm:$0xff]  }
  0x2e   : > { %1052 = vmatmul.mubr.bf16.gmra.mrb[4].mxu0 %v2385_v27  ;;  %1148 = vmatmul.mubr.bf16.gmra.mrb[4].mxu1 %v2386_v29  ;;  %v2471_v27 = vld [vmem:[%s2570_s9 + $0x88] ss:$20 sps:$4 sm:$0xff]   ;;  %v2474_v29 = vld [vmem:[%s2570_s9 + $0xb0] ss:$20 sps:$4 sm:$0xff]  }
  0x2f   : > { %2130 = vmatpush3.bf16.msra.mxu1 %v2388_v30  ;;  %1059 = vmatprep.mubr.bf16.mxu0 %v2391_v32  ;;  %v2475_v30 = vld [vmem:[%s2570_s9 + $0x198] ss:$20 sps:$4 sm:$0xff]  }
  0x30   : > { %2131 = vmatprep.subr.bf16.mxu1 %v2389_v31  ;;  %1155 = vmatprep.mubr.bf16.mxu1 %v2393_v33  ;;  %v2476_v31 = vld [vmem:[%s2570_s9 + $0xd8] ss:$20 sps:$4 sm:$0xff]   ;;  %v2479_v33 = vld [vmem:[%s2570_s9 + $0x100] ss:$20 sps:$4 sm:$0xff]  }
  0x31   : > { %2262 = vmatpush3.bf16.msra.mxu0 %v2430_v47  ;;  %v2477_v32 = vld [vmem:[%s2570_s9 + $0x1c4] ss:$20 sps:$4 sm:$0xff]  }
  0x32   : > { %2263 = vmatprep.subr.bf16.mxu0 %v2449_v56  ;;  %v2496_v47 = vld [vmem:[%s2570_s9 + $0x218] ss:$20 sps:$4 sm:$0xff]  }
  0x33   : > { %2132 = vmatpush3.bf16.msra.mxu1 %v2390_v34  ;;  %v2480_v34 = vld [vmem:[%s2570_s9 + $0x1c0] ss:$20 sps:$4 sm:$0xff]  }
  0x34   : > { %2133 = vmatprep.subr.bf16.mxu1 %v2397_v37  ;;  %v2484_v37 = vld [vmem:[%s2570_s9 + $0x150] ss:$20 sps:$4 sm:$0xff]  }
  0x35   : > { %2264 = vmatpush3.bf16.msra.mxu0 %v2449_v56 }
  0x36   : > { %1060 = vmatmul.mubr.bf16.gmra.mrb[8].mxu0 %v2395_v36  ;;  %1156 = vmatmul.mubr.bf16.gmra.mrb[8].mxu1 %v2396_v38  ;;  %v2482_v36 = vld [vmem:[%s2570_s9 + $0x1ec] ss:$20 sps:$4 sm:$0xff]   ;;  %v2485_v38 = vld [vmem:[%s2570_s9 + $0x1e8] ss:$20 sps:$4 sm:$0xff]  }
  0x37   : > { %2134 = vmatpush3.bf16.msra.mxu1 %v2398_v39  ;;  %1067 = vmatprep.mubr.bf16.mxu0 %v2401_v41  ;;  %v2486_v39 = vld [vmem:[%s2570_s9 + $0x178] ss:$20 sps:$4 sm:$0xff]   ;;  %v2489_v41 = vld [vmem:[%s2570_s9 + $0x1a0] ss:$20 sps:$4 sm:$0xff]  }
  0x38   : > { %2135 = vmatprep.subr.bf16.mxu1 %v2399_v40  ;;  %1163 = vmatprep.mubr.bf16.mxu1 %v2403_v42  ;;  %v2487_v40 = vld [vmem:[%s2570_s9 + $0x214] ss:$20 sps:$4 sm:$0xff]   ;;  %v2490_v42 = vld [vmem:[%s2570_s9 + $0x210] ss:$20 sps:$4 sm:$0xff]  }
  0x3b   : > { %2136 = vmatpush3.bf16.msra.mxu1 %v2400_v43  ;;  %v2491_v43 = vld [vmem:[%s2570_s9 + $0x1c8] ss:$20 sps:$4 sm:$0xff]  }
  0x3c   : > { %2137 = vmatprep.subr.bf16.mxu1 %v2407_v46  ;;  %v2495_v46 = vld [vmem:[%s2570_s9 + $0x238] ss:$20 sps:$4 sm:$0xff]  }
  0x3e   : > { %1068 = vmatmul.mubr.bf16.gmra.mrb[12].mxu0 %v2405_v44  ;;  %1164 = vmatmul.mubr.bf16.gmra.mrb[12].mxu1 %v2406_v45  ;;  %v2492_v44 = vld [vmem:[%s2570_s9 + $0x23c] ss:$20 sps:$4 sm:$0xff]  }
  0x3f   : > { %2138 = vmatpush3.bf16.msra.mxu1 %v2408_v48  ;;  %1075 = vmatprep.mubr.bf16.mxu0 %v2412_v50  ;;  %v2494_v45 = vld [vmem:[%s2570_s9 + $0x1f0] ss:$20 sps:$4 sm:$0xff]   ;;  %v2500_v50 = vld [vmem:[%s2570_s9 + $0x260] ss:$20 sps:$4 sm:$0xff]  }
  0x40   : > { %2139 = vmatprep.subr.bf16.mxu1 %v2409_v49  ;;  %1204 = vmatprep.mubr.bf16.mxu1 %v2416_v51  ;;  %v2497_v48 = vld [vmem:[%s2570_s9 + $0x264] ss:$20 sps:$4 sm:$0xff]   ;;  %v2499_v49 = vld [vmem:[%s2570_s9 + $0x240] ss:$20 sps:$4 sm:$0xff]   ;;  %v2501_v51 = vld [vmem:[%s2570_s9 + $0x268] ss:$20 sps:$4 sm:$0xff]  }
  0x43   : > { %2140 = vmatpush3.bf16.msra.mxu1 %v2411_v52 }
  0x46   : > { %1076 = vmatmul.mubr.bf16.gmra.mrb[16].mxu0 %v2417_v54  ;;  %1205 = vmatmul.mubr.bf16.vlgmr.msra.gmra.mrb[16].mxu1 %v2414_v53 }
  0x47   : > { %1083 = vmatprep.mubr.bf16.mxu0 %v2418_v55  ;;  %1212 = vmatprep.mubr.bf16.mxu1 %v2420_v57 }
  0x4e   : > { %1084 = vmatmul.mubr.bf16.gmra.mrb[20].mxu0 %v2422_v58  ;;  %1213 = vmatmul.mubr.bf16.gmra.mrb[20].mxu1 %v2423_v59 }
  0x4f   : > { %1091 = vmatprep.mubr.bf16.mxu0 %v2424_v60  ;;  %1220 = vmatprep.mubr.bf16.mxu1 %v2426_v61 }
  0x56   : > { %1092 = vmatmul.mubr.bf16.gmra.mrb[24].mxu0 %v2428_v62  ;;  %1221 = vmatmul.mubr.bf16.gmra.mrb[24].mxu1 %v2429_v63 }
  0x57   : > { %1099 = vmatprep.mubr.bf16.mxu0 %v2431_v0  ;;  %1228 = vmatprep.mubr.bf16.mxu1 %v2433_v1 }
  0x5e   : > { %1100 = vmatmul.mubr.bf16.gmra.mrb[28].mxu0 %v2435_v2  ;;  %1229 = vmatmul.mubr.bf16.gmra.mrb[28].mxu1 %v2436_v3 }
  0x5f   : > { %1107 = vmatprep.mubr.bf16.mxu0 %v2437_v4  ;;  %1236 = vmatprep.mubr.bf16.mxu1 %v2439_v5 }
  0x66   : > { %1108 = vmatmul.mubr.bf16.gmra.mrb[32].mxu0 %v2441_v6  ;;  %1237 = vmatmul.mubr.bf16.gmra.mrb[32].mxu1 %v2442_v7 }
  0x67   : > { %1115 = vmatprep.mubr.bf16.mxu0 %v2443_v8  ;;  %1244 = vmatprep.mubr.bf16.mxu1 %v2445_v9 }
  0x6e   : > { %1116 = vmatmul.mubr.bf16.gmra.mrb[36].mxu0 %v2447_v10  ;;  %1245 = vmatmul.mubr.bf16.gmra.mrb[36].mxu1 %v2448_v11 }
  0x6f   : > { %1123 = vmatprep.mubr.bf16.mxu0 %v2450_v12  ;;  %1252 = vmatprep.mubr.bf16.mxu1 %v2452_v13 }
  0x76   : > { %1124 = vmatmul.mubr.bf16.gmra.mrb[40].mxu0 %v2454_v14  ;;  %1253 = vmatmul.mubr.bf16.gmra.mrb[40].mxu1 %v2455_v15 }
  0x77   : > { %1131 = vmatprep.mubr.bf16.mxu0 %v2456_v16  ;;  %1260 = vmatprep.mubr.bf16.mxu1 %v2458_v17 }
  0x7e   : > { %1132 = vmatmul.mubr.bf16.gmra.mrb[44].mxu0 %v2460_v18  ;;  %1261 = vmatmul.mubr.bf16.gmra.mrb[44].mxu1 %v2461_v19 }
  0x7f   : > { %1268 = vmatprep.mubr.bf16.mxu1 %v2462_v20  ;;  %2265 = vmatprep.mubr.msk.bf16.mxu0 %vm962_vm0, %v2464_v21 }
  0x86   : > { %1269 = vmatmul.mubr.bf16.gmra.mrb[48].mxu1 %v2465_v22  ;;  %2266 = vmatmul.mubr.msk.bf16.vlgmr.msra.gmra.mrb[48].mxu0 %vm962_vm0, %v2466_v23 }
  0x87   : > { %1276 = vmatprep.mubr.bf16.mxu1 %v2467_v24  ;;  %2269 = vmatprep.mubr.msk.bf16.mxu0 %vm962_vm0, %v2469_v25 }
  0x8e   : > { %1277 = vmatmul.mubr.bf16.gmra.mrb[52].mxu1 %v2470_v26  ;;  %2270 = vmatmul.mubr.msk.bf16.gmra.mrb[52].mxu0 %vm962_vm0, %v2471_v27 }
  0x8f   : > { %1284 = vmatprep.mubr.bf16.mxu1 %v2472_v28  ;;  %2273 = vmatprep.mubr.msk.bf16.mxu0 %vm962_vm0, %v2474_v29 }
  0x96   : > { %1285 = vmatmul.mubr.bf16.gmra.mrb[56].mxu1 %v2475_v30  ;;  %2274 = vmatmul.mubr.msk.bf16.gmra.mrb[56].mxu0 %vm962_vm0, %v2476_v31 }
  0x97   : > { %1292 = vmatprep.mubr.bf16.mxu1 %v2477_v32  ;;  %2277 = vmatprep.mubr.msk.bf16.mxu0 %vm962_vm0, %v2479_v33 }
  0x9e   : > { %1293 = vmatmul.mubr.bf16.gmra.mrb[60].mxu1 %v2480_v34  ;;  %2278 = vmatmul.mubr.msk.bf16.gmra.mrb[60].mxu0 %vm962_vm0, %v2481_v35 }
  0x9f   : > { %1300 = vmatprep.mubr.bf16.mxu1 %v2482_v36  ;;  %2281 = vmatprep.mubr.msk.bf16.mxu0 %vm962_vm0, %v2484_v37 }
  0xa6   : > { %1301 = vmatmul.mubr.bf16.gmra.mrb[64].mxu1 %v2485_v38  ;;  %2282 = vmatmul.mubr.msk.bf16.gmra.mrb[64].mxu0 %vm962_vm0, %v2486_v39 }
  0xa7   : > { %1308 = vmatprep.mubr.bf16.mxu1 %v2487_v40  ;;  %2285 = vmatprep.mubr.msk.bf16.mxu0 %vm962_vm0, %v2489_v41 }
  0xae   : > { %1309 = vmatmul.mubr.bf16.gmra.mrb[68].mxu1 %v2490_v42  ;;  %2286 = vmatmul.mubr.msk.bf16.gmra.mrb[68].mxu0 %vm962_vm0, %v2491_v43 }
  0xaf   : > { %1316 = vmatprep.mubr.bf16.mxu1 %v2492_v44  ;;  %2289 = vmatprep.mubr.msk.bf16.mxu0 %vm962_vm0, %v2494_v45 }
  0xb6   : > { %1317 = vmatmul.mubr.bf16.gmra.mrb[72].mxu1 %v2495_v46  ;;  %2290 = vmatmul.mubr.msk.bf16.gmra.mrb[72].mxu0 %vm962_vm0, %v2496_v47 }
  0xb7   : > { %1324 = vmatprep.mubr.bf16.mxu1 %v2497_v48  ;;  %2293 = vmatprep.mubr.msk.bf16.mxu0 %vm962_vm0, %v2499_v49 }
  0xbe   : > { %1325 = vmatmul.mubr.bf16.gmra.mrb[76].mxu1 %v2500_v50  ;;  %2294 = vmatmul.mubr.msk.bf16.gmra.mrb[76].mxu0 %vm962_vm0, %v2501_v51 }
  0xf9   : > { %v2101_v52 = vpop.f32.mrb[0].mxu1  ;;  %v2029_v53 = vpop.f32.mrb[0].mxu0 }
  0xfa   : > { %v2102_v54 = vpop.f32.mrb[1].mxu1  ;;  %v2030_v55 = vpop.f32.mrb[1].mxu0 }
  0xfb   : > { %v2749_v56 = vadd.f32 %v2102_v54, %v2101_v52  ;;  %v2104_v57 = vpop.f32.mrb[2].mxu1  ;;  %v2031_v58 = vadd.f32 %v2030_v55, %v2029_v53  ;;  %v2032_v59 = vpop.f32.mrb[2].mxu0 }
  0xfc   : > { %v2105_v60 = vpop.f32.mrb[3].mxu1  ;;  %v2033_v61 = vpop.f32.mrb[3].mxu0 }
  0xfd   : > { %v2751_v62 = vadd.f32 %v2105_v60, %v2104_v57  ;;  %v2034_v63 = vadd.f32 %v2033_v61, %v2032_v59 }
 0x101   : > { %v2107_v0 = vpop.f32.mrb[4].mxu1  ;;  %v2035_v1 = vpop.f32.mrb[4].mxu0 }
 0x102   : > { %v2108_v2 = vpop.f32.mrb[5].mxu1  ;;  %v2036_v3 = vpop.f32.mrb[5].mxu0 }
 0x103   : > { %v2753_v4 = vadd.f32 %v2108_v2, %v2107_v0  ;;  %v2110_v5 = vpop.f32.mrb[6].mxu1  ;;  %v2037_v6 = vadd.f32 %v2036_v3, %v2035_v1  ;;  %v2038_v7 = vpop.f32.mrb[6].mxu0 }
 0x104   : > { %v2111_v8 = vpop.f32.mrb[7].mxu1  ;;  %v2039_v9 = vpop.f32.mrb[7].mxu0 }
 0x105   : > { %v2755_v10 = vadd.f32 %v2111_v8, %v2110_v5  ;;  %v2040_v11 = vadd.f32 %v2039_v9, %v2038_v7 }
 0x109   : > { %v2113_v12 = vpop.f32.mrb[8].mxu1  ;;  %v2041_v13 = vpop.f32.mrb[8].mxu0 }
 0x10a   : > { %v2114_v14 = vpop.f32.mrb[9].mxu1  ;;  %v2042_v15 = vpop.f32.mrb[9].mxu0 }
 0x10b   : > { %v2757_v16 = vadd.f32 %v2114_v14, %v2113_v12  ;;  %v2116_v17 = vpop.f32.mrb[10].mxu1  ;;  %v2043_v18 = vadd.f32 %v2042_v15, %v2041_v13  ;;  %v2044_v19 = vpop.f32.mrb[10].mxu0 }
 0x10c   : > { %v2117_v20 = vpop.f32.mrb[11].mxu1  ;;  %v2045_v21 = vpop.f32.mrb[11].mxu0 }
 0x10d   : > { %v2759_v22 = vadd.f32 %v2117_v20, %v2116_v17  ;;  %v2046_v23 = vadd.f32 %v2045_v21, %v2044_v19 }
 0x111   : > { %v2119_v24 = vpop.f32.mrb[12].mxu1  ;;  %v2047_v25 = vpop.f32.mrb[12].mxu0 }
 0x112   : > { %v2120_v26 = vpop.f32.mrb[13].mxu1  ;;  %v2048_v27 = vpop.f32.mrb[13].mxu0 }
 0x113   : > { %v2761_v28 = vadd.f32 %v2120_v26, %v2119_v24  ;;  %v2122_v29 = vpop.f32.mrb[14].mxu1  ;;  %v2049_v30 = vadd.f32 %v2048_v27, %v2047_v25  ;;  %v2050_v31 = vpop.f32.mrb[14].mxu0 }
 0x114   : > { %v2123_v32 = vpop.f32.mrb[15].mxu1  ;;  %v2051_v33 = vpop.f32.mrb[15].mxu0 }
 0x115   : > { %v2763_v34 = vadd.f32 %v2123_v32, %v2122_v29  ;;  %v2052_v35 = vadd.f32 %v2051_v33, %v2050_v31 }
 0x119   : > { %v2141_v36 = vpop.f32.mrb[16].mxu1  ;;  %v2053_v37 = vpop.f32.mrb[16].mxu0 }
 0x11a   : > { %v2142_v38 = vpop.f32.mrb[17].mxu1  ;;  %v2054_v39 = vpop.f32.mrb[17].mxu0 }
 0x11b   : > { %v2143_v40 = vadd.f32 %v2142_v38, %v2141_v36  ;;  %v2144_v41 = vpop.f32.mrb[18].mxu1  ;;  %v2055_v42 = vadd.f32 %v2054_v39, %v2053_v37  ;;  %v2056_v43 = vpop.f32.mrb[18].mxu0 }
 0x11c   : > { %v2145_v44 = vpop.f32.mrb[19].mxu1  ;;  %v2057_v45 = vpop.f32.mrb[19].mxu0 }
 0x11d   : > { %v2146_v46 = vadd.f32 %v2145_v44, %v2144_v41  ;;  %v2058_v47 = vadd.f32 %v2057_v45, %v2056_v43  ;;  %v2765_v48 = vadd.f32 %v2143_v40, %v2031_v58 }
 0x11f   : > { %v2767_v49 = vadd.f32 %v2146_v46, %v2034_v63 }
 0x121   : > { %v2147_v50 = vpop.f32.mrb[20].mxu1  ;;  %v2059_v51 = vpop.f32.mrb[20].mxu0 }
 0x122   : > { %v2148_v52 = vpop.f32.mrb[21].mxu1  ;;  %v2060_v53 = vpop.f32.mrb[21].mxu0 }
 0x123   : > { %v2149_v54 = vadd.f32 %v2148_v52, %v2147_v50  ;;  %v2150_v55 = vpop.f32.mrb[22].mxu1  ;;  %v2061_v57 = vadd.f32 %v2060_v53, %v2059_v51  ;;  %v2062_v59 = vpop.f32.mrb[22].mxu0 }
 0x124   : > { %v2151_v60 = vpop.f32.mrb[23].mxu1  ;;  %v2063_v61 = vpop.f32.mrb[23].mxu0 }
 0x125   : > { %v2152_v0 = vadd.f32 %v2151_v60, %v2150_v55  ;;  %v2064_v1 = vadd.f32 %v2063_v61, %v2062_v59  ;;  %v2769_v2 = vadd.f32 %v2149_v54, %v2037_v6 }
 0x127   : > { %v2771_v3 = vadd.f32 %v2152_v0, %v2040_v11 }
 0x129   : > { %v2153_v58 = vpop.f32.mrb[24].mxu1  ;;  %v2065_v5 = vpop.f32.mrb[24].mxu0 }
 0x12a   : > { %v2154_v63 = vpop.f32.mrb[25].mxu1  ;;  %v2066_v7 = vpop.f32.mrb[25].mxu0 }
 0x12b   : > { %v2155_v8 = vadd.f32 %v2154_v63, %v2153_v58  ;;  %v2156_v9 = vpop.f32.mrb[26].mxu1  ;;  %v2067_v12 = vadd.f32 %v2066_v7, %v2065_v5  ;;  %v2068_v13 = vpop.f32.mrb[26].mxu0 }
 0x12c   : > { %v2157_v14 = vpop.f32.mrb[27].mxu1  ;;  %v2069_v15 = vpop.f32.mrb[27].mxu0 }
 0x12d   : > { %v2158_v17 = vadd.f32 %v2157_v14, %v2156_v9  ;;  %v2070_v19 = vadd.f32 %v2069_v15, %v2068_v13  ;;  %v2773_v20 = vadd.f32 %v2155_v8, %v2043_v18 }
 0x12f   : > { %v2775_v21 = vadd.f32 %v2158_v17, %v2046_v23 }
 0x131   : > { %v2159_v6 = vpop.f32.mrb[28].mxu1  ;;  %v2071_v24 = vpop.f32.mrb[28].mxu0 }
 0x132   : > { %v2160_v11 = vpop.f32.mrb[29].mxu1  ;;  %v2072_v25 = vpop.f32.mrb[29].mxu0 }
 0x133   : > { %v2161_v26 = vadd.f32 %v2160_v11, %v2159_v6  ;;  %v2162_v27 = vpop.f32.mrb[30].mxu1  ;;  %v2073_v29 = vadd.f32 %v2072_v25, %v2071_v24  ;;  %v2074_v31 = vpop.f32.mrb[30].mxu0 }
 0x134   : > { %v2163_v32 = vpop.f32.mrb[31].mxu1  ;;  %v2075_v33 = vpop.f32.mrb[31].mxu0 }
 0x135   : > { %v2164_v36 = vadd.f32 %v2163_v32, %v2162_v27  ;;  %v2076_v37 = vadd.f32 %v2075_v33, %v2074_v31  ;;  %v2777_v38 = vadd.f32 %v2161_v26, %v2049_v30 }
 0x137   : > { %v2779_v39 = vadd.f32 %v2164_v36, %v2052_v35 }
 0x139   : > { %v2165_v18 = vpop.f32.mrb[32].mxu1  ;;  %v2077_v40 = vpop.f32.mrb[32].mxu0 }
 0x13a   : > { %v2166_v23 = vpop.f32.mrb[33].mxu1  ;;  %v2078_v41 = vpop.f32.mrb[33].mxu0 }
 0x13b   : > { %v2167_v43 = vadd.f32 %v2166_v23, %v2165_v18  ;;  %v2168_v44 = vpop.f32.mrb[34].mxu1  ;;  %v2781_v45 = vadd.f32 %v2078_v41, %v2077_v40  ;;  %v2080_v46 = vpop.f32.mrb[34].mxu0 }
 0x13c   : > { %v2169_v50 = vpop.f32.mrb[35].mxu1  ;;  %v2081_v51 = vpop.f32.mrb[35].mxu0 }
 0x13d   : > { %v2170_v52 = vadd.f32 %v2169_v50, %v2168_v44  ;;  %v2783_v53 = vadd.f32 %v2081_v51, %v2080_v46  ;;  %v2785_v54 = vadd.f32 %v2167_v43, %v2055_v42 }
 0x13f   : > { %v2787_v30 = vadd.f32 %v2170_v52, %v2058_v47 }
 0x141   : > { %v2171_v35 = vpop.f32.mrb[36].mxu1  ;;  %v2083_v55 = vpop.f32.mrb[36].mxu0 }
 0x142   : > { %v2172_v59 = vpop.f32.mrb[37].mxu1  ;;  %v2084_v60 = vpop.f32.mrb[37].mxu0 }
 0x143   : > { %v2173_v61 = vadd.f32 %v2172_v59, %v2171_v35  ;;  %v2174_v0 = vpop.f32.mrb[38].mxu1  ;;  %v2789_v58 = vadd.f32 %v2084_v60, %v2083_v55  ;;  %v2086_v5 = vpop.f32.mrb[38].mxu0 }
 0x144   : > { %v2175_v63 = vpop.f32.mrb[39].mxu1  ;;  %v2087_v7 = vpop.f32.mrb[39].mxu0 }
 0x145   : > { %v2176_v8 = vadd.f32 %v2175_v63, %v2174_v0  ;;  %v2791_v9 = vadd.f32 %v2087_v7, %v2086_v5  ;;  %v2793_v13 = vadd.f32 %v2173_v61, %v2061_v57  ;;  %v2817_v0 = vld [vmem:[%s2941_s2] ss:$0 sm:$0xff] }
 0x147   : > { %v2795_v42 = vadd.f32 %v2176_v8, %v2064_v1 }
 0x149   : > { %v2177_v47 = vpop.f32.mrb[40].mxu1  ;;  %v2089_v14 = vpop.f32.mrb[40].mxu0 }
 0x14a   : > { %v2178_v15 = vpop.f32.mrb[41].mxu1  ;;  %v2090_v17 = vpop.f32.mrb[41].mxu0 }
 0x14b   : > { %v2179_v6 = vadd.f32 %v2178_v15, %v2177_v47  ;;  %v2180_v24 = vpop.f32.mrb[42].mxu1  ;;  %v2797_v11 = vadd.f32 %v2090_v17, %v2089_v14  ;;  %v2092_v25 = vpop.f32.mrb[42].mxu0 }
 0x14c   : > { %v2181_v26 = vpop.f32.mrb[43].mxu1  ;;  %v2093_v27 = vpop.f32.mrb[43].mxu0 }
 0x14d   : > { %v2182_v31 = vadd.f32 %v2181_v26, %v2180_v24  ;;  %v2799_v32 = vadd.f32 %v2093_v27, %v2092_v25  ;;  %v2801_v33 = vadd.f32 %v2179_v6, %v2067_v12 }
 0x14f   : > { %v2803_v57 = vadd.f32 %v2182_v31, %v2070_v19 }
 0x151   : > { %v2183_v1 = vpop.f32.mrb[44].mxu1  ;;  %v2095_v36 = vpop.f32.mrb[44].mxu0 }
 0x152   : > { %v2184_v18 = vpop.f32.mrb[45].mxu1  ;;  %v2096_v40 = vpop.f32.mrb[45].mxu0 }
 0x153   : > { %v2185_v23 = vadd.f32 %v2184_v18, %v2183_v1  ;;  %v2186_v41 = vpop.f32.mrb[46].mxu1  ;;  %v2805_v43 = vadd.f32 %v2096_v40, %v2095_v36  ;;  %v2098_v44 = vpop.f32.mrb[46].mxu0 }
 0x154   : > { %v2187_v46 = vpop.f32.mrb[47].mxu1  ;;  %v2099_v50 = vpop.f32.mrb[47].mxu0 }
 0x155   : > { %v2188_v51 = vadd.f32 %v2187_v46, %v2186_v41  ;;  %v2807_v52 = vadd.f32 %v2099_v50, %v2098_v44  ;;  %v2809_v35 = vadd.f32 %v2185_v23, %v2073_v29 }
 0x157   : > { %v2811_v12 = vadd.f32 %v2188_v51, %v2076_v37 }
 0x159   : > { %v2189_v19 = vpop.f32.mrb[48].mxu1  ;;  %v2267_v55 = vpop.f32.mrb[48].mxu0 }
 0x15a   : > { %v1376_v59 = vadd.f32 %v2267_v55, %v2769_v2  ;;  %v2190_v60 = vpop.f32.mrb[49].mxu1  ;;  %v1367_v61 = vpop.f32.mrb[49].mxu0 }
 0x15b   : > { %v2191_v5 = vadd.f32 %v2190_v60, %v2189_v19  ;;  %v1368_v63 = vadd.f32 %v1367_v61, %v2765_v48  ;;  %v2192_v7 = vpop.f32.mrb[50].mxu1  ;;  %v2268_v29 = vpop.f32.mrb[50].mxu0 }
 0x15c   : > { %v1496_v8 = vmul.f32 7.468167e-05, %v1376_v59  ;;  %v1379_v37 = vadd.f32 %v2268_v29, %v2771_v3  ;;  %v2193_v47 = vpop.f32.mrb[51].mxu1  ;;  %v1370_v14 = vpop.f32.mrb[51].mxu0 }
 0x15d   : > { %v1494_v15 = vmul.f32 7.468167e-05, %v1368_v63  ;;  %v2194_v2 = vadd.f32 %v2193_v47, %v2192_v7  ;;  %v1371_v17 = vadd.f32 %v1370_v14, %v2767_v49  ;;  %v2823_v6 = vadd.f32 %v2191_v5, %v2781_v45 }
 0x15e   : > { %v1535_v24 = vadd.f32 %v2817_v0, %v1496_v8  ;;  %v1497_v25 = vmul.f32 7.468167e-05, %v1379_v37 }
 0x15f   : > { %v1533_v48 = vadd.f32 %v2817_v0, %v1494_v15  ;;  %v1495_v26 = vmul.f32 7.468167e-05, %v1371_v17  ;;  %v2830_v27 = vadd.f32 %v2194_v2, %v2783_v53 }
 0x160   : > { %v2316_v3 = vround.rtne.f32 %v1535_v24  ;;  %v1536_v31 = vadd.f32 %v2817_v0, %v1497_v25 }
 0x161   : > { %v2314_v1 = vround.rtne.f32 %v1533_v48  ;;  %v1534_v49 = vadd.f32 %v2817_v0, %v1495_v26  ;;  %v2195_v45 = vpop.f32.mrb[52].mxu1  ;;  %v2271_v36 = vpop.f32.mrb[52].mxu0 }
 0x162   : > { %v1631_v18 = vmax.f32 %v2316_v3, 0.0  ;;  %v2317_v40 = vround.rtne.f32 %v1536_v31  ;;  %v1392_v23 = vadd.f32 %v2271_v36, %v2777_v38  ;;  %v2196_v41 = vpop.f32.mrb[53].mxu1  ;;  %v1383_v44 = vpop.f32.mrb[53].mxu0 }
 0x163   : > { %v1629_v46 = vmax.f32 %v2314_v1, 0.0  ;;  %v2315_v50 = vround.rtne.f32 %v1534_v49  ;;  %v2197_v51 = vadd.f32 %v2196_v41, %v2195_v45  ;;  %v1384_v53 = vadd.f32 %v1383_v44, %v2773_v20  ;;  %v2198_v19 = vpop.f32.mrb[54].mxu1  ;;  %v2272_v55 = vpop.f32.mrb[54].mxu0 }
 0x164   : > { %v1663_v59 = vmin.f32 %v1631_v18, 255.0  ;;  %v1632_v60 = vmax.f32 %v2317_v40, 0.0  ;;  %v1500_v61 = vmul.f32 7.468167e-05, %v1392_v23  ;;  %v1395_v5 = vadd.f32 %v2272_v55, %v2779_v39  ;;  %v2199_v63 = vpop.f32.mrb[55].mxu1  ;;  %v1386_v7 = vpop.f32.mrb[55].mxu0 }
 0x165   : > { %v1661_v29 = vmin.f32 %v1629_v46, 255.0  ;;  %v1630_v38 = vmax.f32 %v2315_v50, 0.0  ;;  %v1498_v8 = vmul.f32 7.468167e-05, %v1384_v53  ;;  %v2200_v37 = vadd.f32 %v2199_v63, %v2198_v19 }
 0x166   : > { %v1695_v47 = vtrunc.f32 %v1663_v59  ;;  %v1664_v14 = vmin.f32 %v1632_v60, 255.0  ;;  %v1539_v20 = vadd.f32 %v2817_v0, %v1500_v61  ;;  %v1501_v15 = vmul.f32 7.468167e-05, %v1395_v5 }
 0x167   : > { %v1693_v2 = vtrunc.f32 %v1661_v29  ;;  %v1662_v17 = vmin.f32 %v1630_v38, 255.0  ;;  %v1537_v24 = vadd.f32 %v2817_v0, %v1498_v8  ;;  %v1387_v39 = vadd.f32 %v1386_v7, %v2775_v21 }
 0x168   : > { %v1696_v25 = vtrunc.f32 %v1664_v14  ;;  %v2320_v48 = vround.rtne.f32 %v1539_v20  ;;  %v1540_v26 = vadd.f32 %v2817_v0, %v1501_v15  ;;  %v2845_v3 = vadd.f32 %v2197_v51, %v2789_v58 }
 0x169   : > { %v1694_v31 = vtrunc.f32 %v1662_v17  ;;  %v2318_v1 = vround.rtne.f32 %v1537_v24  ;;  %v1499_v49 = vmul.f32 7.468167e-05, %v1387_v39  ;;  %v2201_v45 = vpop.f32.mrb[56].mxu1  ;;  %v2275_v36 = vpop.f32.mrb[56].mxu0  ;;  %v2849_v18 = vadd.f32 %v2200_v37, %v2791_v9 }
 0x16a   : > { %v1729_v40 = vpack.c.f32.eXmY %v1695_v47, %v1696_v25, 56  ;;  %v1635_v23 = vmax.f32 %v2320_v48, 0.0  ;;  %v2321_v41 = vround.rtne.f32 %v1540_v26  ;;  %v1408_v21 = vadd.f32 %v2275_v36, %v2793_v13  ;;  %v2202_v44 = vpop.f32.mrb[57].mxu1  ;;  %v1399_v46 = vpop.f32.mrb[57].mxu0 }
 0x16b   : > { %v1725_v50 = vpack.c.f32.eXmY %v1693_v2, %v1694_v31, 56  ;;  %v1633_v53 = vmax.f32 %v2318_v1, 0.0  ;;  %v1538_v58 = vadd.f32 %v2817_v0, %v1499_v49  ;;  %v2203_v51 = vadd.f32 %v2202_v44, %v2201_v45  ;;  %v2204_v19 = vpop.f32.mrb[58].mxu1  ;;  %v2276_v55 = vpop.f32.mrb[58].mxu0 }
 0x16c   : > { %v1667_v9 = vmin.f32 %v1635_v23, 255.0  ;;  %v1636_v59 = vmax.f32 %v2321_v41, 0.0  ;;  %v1504_v60 = vmul.f32 7.468167e-05, %v1408_v21  ;;  %v1400_v13 = vadd.f32 %v1399_v46, %v2785_v54  ;;  %v2205_v61 = vpop.f32.mrb[59].mxu1  ;;  %v1402_v5 = vpop.f32.mrb[59].mxu0 }
 0x16d   : > { %v1733_v63 = vpack.c.b8 %v1729_v40, %v1725_v50  ;;  %v1665_v7 = vmin.f32 %v1633_v53, 255.0  ;;  %v2319_v29 = vround.rtne.f32 %v1538_v58  ;;  %v1411_v38 = vadd.f32 %v2276_v55, %v2795_v42 }
 0x16e   : > { %v1699_v8 = vtrunc.f32 %v1667_v9  ;;  %v1668_v37 = vmin.f32 %v1636_v59, 255.0  ;;  %v1543_v47 = vadd.f32 %v2817_v0, %v1504_v60  ;;  %v1502_v14 = vmul.f32 7.468167e-05, %v1400_v13 }
 0x16f   : > { %1805 = vst.msk [vmem:[%s2856_s22] sm:$0xff] %vm962_vm0, %v1733_v63  ;;  %v1697_v20 = vtrunc.f32 %v1665_v7  ;;  %v1634_v15 = vmax.f32 %v2319_v29, 0.0  ;;  %v1505_v2 = vmul.f32 7.468167e-05, %v1411_v38  ;;  %v2206_v17 = vadd.f32 %v2205_v61, %v2204_v19 }
 0x170   : > { %v1700_v24 = vtrunc.f32 %v1668_v37  ;;  %v2324_v54 = vround.rtne.f32 %v1543_v47  ;;  %v1541_v39 = vadd.f32 %v2817_v0, %v1502_v14  ;;  %v1403_v25 = vadd.f32 %v1402_v5, %v2787_v30 }
 0x171   : > { %v1666_v48 = vmin.f32 %v1634_v15, 255.0  ;;  %v1544_v42 = vadd.f32 %v2817_v0, %v1505_v2  ;;  %v2207_v26 = vpop.f32.mrb[60].mxu1  ;;  %v2279_v31 = vpop.f32.mrb[60].mxu0  ;;  %v2867_v1 = vadd.f32 %v2203_v51, %v2797_v11  ;;  %v2870_v49 = vadd.f32 %v2206_v17, %v2799_v32 }
 0x172   : > { %v1739_v45 = vpack.c.f32.eXmY %v1699_v8, %v1700_v24, 56  ;;  %v1639_v36 = vmax.f32 %v2324_v54, 0.0  ;;  %v2322_v40 = vround.rtne.f32 %v1541_v39  ;;  %v1503_v23 = vmul.f32 7.468167e-05, %v1403_v25  ;;  %v2208_v41 = vpop.f32.mrb[61].mxu1  ;;  %v1415_v21 = vpop.f32.mrb[61].mxu0 }
 0x173   : > { %v1698_v44 = vtrunc.f32 %v1666_v48  ;;  %v2325_v46 = vround.rtne.f32 %v1544_v42  ;;  %v1424_v30 = vadd.f32 %v2279_v31, %v2809_v35  ;;  %v2209_v50 = vadd.f32 %v2208_v41, %v2207_v26  ;;  %v2210_v53 = vpop.f32.mrb[62].mxu1  ;;  %v2280_v58 = vpop.f32.mrb[62].mxu0 }
 0x174   : > { %v1671_v19 = vmin.f32 %v1639_v36, 255.0  ;;  %v1637_v55 = vmax.f32 %v2322_v40, 0.0  ;;  %v1542_v11 = vadd.f32 %v2817_v0, %v1503_v23  ;;  %v1416_v32 = vadd.f32 %v1415_v21, %v2801_v33  ;;  %v2211_v51 = vpop.f32.mrb[63].mxu1  ;;  %v1418_v9 = vpop.f32.mrb[63].mxu0 }
 0x175   : > { %v1735_v59 = vpack.c.f32.eXmY %v1697_v20, %v1698_v44, 56  ;;  %v1640_v60 = vmax.f32 %v2325_v46, 0.0  ;;  %v1508_v13 = vmul.f32 7.468167e-05, %v1424_v30  ;;  %v1427_v61 = vadd.f32 %v2280_v58, %v2811_v12 }
 0x176   : > { %v1703_v5 = vtrunc.f32 %v1671_v19  ;;  %v1669_v63 = vmin.f32 %v1637_v55, 255.0  ;;  %v2323_v35 = vround.rtne.f32 %v1542_v11  ;;  %v1506_v7 = vmul.f32 7.468167e-05, %v1416_v32 }
 0x177   : > { %v1743_v29 = vpack.c.b8 %v1739_v45, %v1735_v59  ;;  %v1672_v38 = vmin.f32 %v1640_v60, 255.0  ;;  %v1547_v8 = vadd.f32 %v2817_v0, %v1508_v13  ;;  %v1509_v37 = vmul.f32 7.468167e-05, %v1427_v61 }
 0x178   : > { %v1701_v47 = vtrunc.f32 %v1669_v63  ;;  %v1638_v14 = vmax.f32 %v2323_v35, 0.0  ;;  %v1545_v33 = vadd.f32 %v2817_v0, %v1506_v7  ;;  %v2878_v15 = vadd.f32 %v2211_v51, %v2210_v53 }
 0x179   : > { %1806 = vst.msk [vmem:[%s2856_s22 + $0x8] sm:$0xff] %vm962_vm0, %v1743_v29  ;;  %v1704_v20 = vtrunc.f32 %v1672_v38  ;;  %v2328_v2 = vround.rtne.f32 %v1547_v8  ;;  %v1548_v12 = vadd.f32 %v2817_v0, %v1509_v37  ;;  %v1419_v17 = vadd.f32 %v1418_v9, %v2803_v57  ;;  %v2213_v24 = vpop.f32.mrb[64].mxu1  ;;  %v2283_v54 = vpop.f32.mrb[64].mxu0 }
 0x17a   : > { %v1670_v39 = vmin.f32 %v1638_v14, 255.0  ;;  %v2326_v25 = vround.rtne.f32 %v1545_v33  ;;  %v1440_v48 = vadd.f32 %v2283_v54, %v2845_v3  ;;  %v2214_v42 = vpop.f32.mrb[65].mxu1  ;;  %v1431_v26 = vpop.f32.mrb[65].mxu0  ;;  %v1295_v31 = vadd.f32 %v2209_v50, %v2805_v43 }
 0x17b   : > { %v1749_v45 = vpack.c.f32.eXmY %v1703_v5, %v1704_v20, 56  ;;  %v1643_v36 = vmax.f32 %v2328_v2, 0.0  ;;  %v2329_v40 = vround.rtne.f32 %v1548_v12  ;;  %v1507_v23 = vmul.f32 7.468167e-05, %v1419_v17  ;;  %v2216_v41 = vpop.f32.mrb[66].mxu1  ;;  %v2284_v21 = vpop.f32.mrb[66].mxu0 }
 0x17c   : > { %v1702_v44 = vtrunc.f32 %v1670_v39  ;;  %v1641_v46 = vmax.f32 %v2326_v25, 0.0  ;;  %v1512_v30 = vmul.f32 7.468167e-05, %v1440_v48  ;;  %v2886_v57 = vadd.f32 %v2214_v42, %v2213_v24  ;;  %v2217_v53 = vpop.f32.mrb[67].mxu1  ;;  %v1434_v58 = vpop.f32.mrb[67].mxu0 }
 0x17d   : > { %v1675_v19 = vmin.f32 %v1643_v36, 255.0  ;;  %v1644_v55 = vmax.f32 %v2329_v40, 0.0  ;;  %v1546_v3 = vadd.f32 %v2817_v0, %v1507_v23  ;;  %v1432_v11 = vadd.f32 %v1431_v26, %v2823_v6 }
 0x17e   : > { %v1745_v43 = vpack.c.f32.eXmY %v1701_v47, %v1702_v44, 56  ;;  %v1673_v50 = vmin.f32 %v1641_v46, 255.0  ;;  %v1551_v32 = vadd.f32 %v2817_v0, %v1512_v30  ;;  %v1443_v51 = vadd.f32 %v2284_v21, %v2849_v18 }
 0x17f   : > { %v1707_v9 = vtrunc.f32 %v1675_v19  ;;  %v1676_v59 = vmin.f32 %v1644_v55, 255.0  ;;  %v2327_v60 = vround.rtne.f32 %v1546_v3  ;;  %v1510_v13 = vmul.f32 7.468167e-05, %v1432_v11 }
 0x180   : > { %v1753_v61 = vpack.c.b8 %v1749_v45, %v1745_v43  ;;  %v1705_v5 = vtrunc.f32 %v1673_v50  ;;  %v2332_v63 = vround.rtne.f32 %v1551_v32  ;;  %v1513_v35 = vmul.f32 7.468167e-05, %v1443_v51 }
 0x181   : > { %v1708_v7 = vtrunc.f32 %v1676_v59  ;;  %v1642_v29 = vmax.f32 %v2327_v60, 0.0  ;;  %v1549_v38 = vadd.f32 %v2817_v0, %v1510_v13  ;;  %v2893_v6 = vadd.f32 %v2217_v53, %v2216_v41  ;;  %v2219_v8 = vpop.f32.mrb[68].mxu1  ;;  %v2287_v37 = vpop.f32.mrb[68].mxu0 }
 0x182   : > { %1807 = vst.msk [vmem:[%s2856_s22 + $0x10] sm:$0xff] %vm962_vm0, %v1753_v61  ;;  %v1647_v47 = vmax.f32 %v2332_v63, 0.0  ;;  %v1552_v18 = vadd.f32 %v2817_v0, %v1513_v35  ;;  %v1435_v14 = vadd.f32 %v1434_v58, %v2830_v27  ;;  %v1456_v33 = vadd.f32 %v2287_v37, %v1295_v31  ;;  %v2220_v20 = vpop.f32.mrb[69].mxu1  ;;  %v1447_v2 = vpop.f32.mrb[69].mxu0 }
 0x183   : > { %v1759_v12 = vpack.c.f32.eXmY %v1707_v9, %v1708_v7, 56  ;;  %v1674_v17 = vmin.f32 %v1642_v29, 255.0  ;;  %v2330_v24 = vround.rtne.f32 %v1549_v38  ;;  %v2221_v54 = vadd.f32 %v2220_v20, %v2219_v8  ;;  %v2222_v39 = vpop.f32.mrb[70].mxu1  ;;  %v2288_v25 = vpop.f32.mrb[70].mxu0 }
 0x184   : > { %v1679_v48 = vmin.f32 %v1647_v47, 255.0  ;;  %v2333_v42 = vround.rtne.f32 %v1552_v18  ;;  %v1511_v26 = vmul.f32 7.468167e-05, %v1435_v14  ;;  %v1516_v45 = vmul.f32 7.468167e-05, %v1456_v33  ;;  %v2223_v36 = vpop.f32.mrb[71].mxu1 }
 0x185   : > { %v1706_v40 = vtrunc.f32 %v1674_v17  ;;  %v1645_v23 = vmax.f32 %v2330_v24, 0.0  ;;  %v1448_v41 = vadd.f32 %v1447_v2, %v2867_v1  ;;  %v1298_v27 = vadd.f32 %v2878_v15, %v2807_v52  ;;  %v1450_v31 = vpop.f32.mrb[71].mxu0 }
 0x186   : > { %v1711_v21 = vtrunc.f32 %v1679_v48  ;;  %v1648_v44 = vmax.f32 %v2333_v42, 0.0  ;;  %v1550_v46 = vadd.f32 %v2817_v0, %v1511_v26  ;;  %v1555_v30 = vadd.f32 %v2817_v0, %v1516_v45 }
 0x187   : > { %v1755_v53 = vpack.c.f32.eXmY %v1705_v5, %v1706_v40, 56  ;;  %v1677_v58 = vmin.f32 %v1645_v23, 255.0  ;;  %v1514_v19 = vmul.f32 7.468167e-05, %v1448_v41  ;;  %v1459_v55 = vadd.f32 %v2288_v25, %v1298_v27 }
 0x188   : > { %v1680_v3 = vmin.f32 %v1648_v44, 255.0  ;;  %v2331_v11 = vround.rtne.f32 %v1550_v46  ;;  %v2336_v43 = vround.rtne.f32 %v1555_v30  ;;  %v2224_v50 = vadd.f32 %v2223_v36, %v2222_v39 }
 0x189   : > { %v1763_v1 = vpack.c.b8 %v1759_v12, %v1755_v53  ;;  %v1709_v32 = vtrunc.f32 %v1677_v58  ;;  %v1553_v52 = vadd.f32 %v2817_v0, %v1514_v19  ;;  %v1517_v15 = vmul.f32 7.468167e-05, %v1459_v55  ;;  %v2225_v51 = vpop.f32.mrb[72].mxu1  ;;  %v2291_v9 = vpop.f32.mrb[72].mxu0 }
 0x18a   : > { %v1712_v59 = vtrunc.f32 %v1680_v3  ;;  %v1646_v60 = vmax.f32 %v2331_v11, 0.0  ;;  %v1651_v13 = vmax.f32 %v2336_v43, 0.0  ;;  %v1451_v61 = vadd.f32 %v1450_v31, %v2870_v49  ;;  %v2226_v5 = vpop.f32.mrb[73].mxu1  ;;  %v1463_v63 = vpop.f32.mrb[73].mxu0 }
 0x18b   : > { %1808 = vst.msk [vmem:[%s2856_s22 + $0x18] sm:$0xff] %vm962_vm0, %v1763_v1  ;;  %v2334_v35 = vround.rtne.f32 %v1553_v52  ;;  %v1556_v7 = vadd.f32 %v2817_v0, %v1517_v15  ;;  %v1311_v29 = vadd.f32 %v2221_v54, %v2753_v4  ;;  %v2227_v38 = vadd.f32 %v2226_v5, %v2225_v51  ;;  %v2228_v8 = vpop.f32.mrb[74].mxu1  ;;  %v2292_v37 = vpop.f32.mrb[74].mxu0 }
 0x18c   : > { %v1769_v47 = vpack.c.f32.eXmY %v1711_v21, %v1712_v59, 56  ;;  %v1678_v18 = vmin.f32 %v1646_v60, 255.0  ;;  %v1683_v14 = vmin.f32 %v1651_v13, 255.0  ;;  %v1515_v33 = vmul.f32 7.468167e-05, %v1451_v61  ;;  %v2229_v20 = vpop.f32.mrb[75].mxu1 }
 0x18d   : > { %v1649_v2 = vmax.f32 %v2334_v35, 0.0  ;;  %v2337_v12 = vround.rtne.f32 %v1556_v7  ;;  %v1472_v49 = vadd.f32 %v2291_v9, %v1311_v29  ;;  %v1303_v17 = vadd.f32 %v2886_v57, %v2749_v56  ;;  %v1466_v24 = vpop.f32.mrb[75].mxu0 }
 0x18e   : > { %v1710_v39 = vtrunc.f32 %v1678_v18  ;;  %v1715_v25 = vtrunc.f32 %v1683_v14  ;;  %v1554_v48 = vadd.f32 %v2817_v0, %v1515_v33  ;;  %v1314_v4 = vadd.f32 %v2224_v50, %v2755_v10 }
 0x18f   : > { %v1681_v54 = vmin.f32 %v1649_v2, 255.0  ;;  %v1652_v42 = vmax.f32 %v2337_v12, 0.0  ;;  %v1520_v26 = vmul.f32 7.468167e-05, %v1472_v49  ;;  %v1464_v45 = vadd.f32 %v1463_v63, %v1303_v17 }
 0x190   : > { %v1765_v36 = vpack.c.f32.eXmY %v1709_v32, %v1710_v39, 56  ;;  %v2335_v40 = vround.rtne.f32 %v1554_v48  ;;  %v1475_v23 = vadd.f32 %v2292_v37, %v1314_v4  ;;  %v2230_v41 = vadd.f32 %v2229_v20, %v2228_v8 }
 0x191   : > { %v1713_v27 = vtrunc.f32 %v1681_v54  ;;  %v1684_v31 = vmin.f32 %v1652_v42, 255.0  ;;  %v1559_v21 = vadd.f32 %v2817_v0, %v1520_v26  ;;  %v1518_v56 = vmul.f32 7.468167e-05, %v1464_v45  ;;  %v2231_v57 = vpop.f32.mrb[76].mxu1  ;;  %v2295_v44 = vpop.f32.mrb[76].mxu0 }
 0x192   : > { %v1773_v46 = vpack.c.b8 %v1769_v47, %v1765_v36  ;;  %v1650_v30 = vmax.f32 %v2335_v40, 0.0  ;;  %v1521_v53 = vmul.f32 7.468167e-05, %v1475_v23  ;;  %v1306_v10 = vadd.f32 %v2893_v6, %v2751_v62  ;;  %v2232_v58 = vpop.f32.mrb[77].mxu1  ;;  %v1479_v19 = vpop.f32.mrb[77].mxu0 }
 0x193   : > { %v1716_v55 = vtrunc.f32 %v1684_v31  ;;  %v2340_v3 = vround.rtne.f32 %v1559_v21  ;;  %v1557_v11 = vadd.f32 %v2817_v0, %v1518_v56  ;;  %v2233_v43 = vadd.f32 %v2232_v58, %v2231_v57  ;;  %v2234_v50 = vpop.f32.mrb[78].mxu1  ;;  %v2296_v1 = vpop.f32.mrb[78].mxu0 }
 0x194   : > { %1809 = vst.msk [vmem:[%s2856_s22 + $0x20] sm:$0xff] %vm962_vm0, %v1773_v46  ;;  %v1682_v32 = vmin.f32 %v1650_v30, 255.0  ;;  %v1560_v52 = vadd.f32 %v2817_v0, %v1521_v53  ;;  %v1467_v15 = vadd.f32 %v1466_v24, %v1306_v10  ;;  %v1319_v51 = vadd.f32 %v2227_v38, %v2757_v16  ;;  %v2235_v9 = vpop.f32.mrb[79].mxu1  ;;  %v1482_v59 = vpop.f32.mrb[79].mxu0 }
 0x195   : > { %v1779_v62 = vpack.c.f32.eXmY %v1715_v25, %v1716_v55, 56  ;;  %v1655_v6 = vmax.f32 %v2340_v3, 0.0  ;;  %v2338_v60 = vround.rtne.f32 %v1557_v11  ;;  %v1327_v13 = vadd.f32 %v2233_v43, %v2761_v28 }
 0x196   : > { %v1714_v61 = vtrunc.f32 %v1682_v32  ;;  %v2341_v5 = vround.rtne.f32 %v1560_v52  ;;  %v1519_v63 = vmul.f32 7.468167e-05, %v1467_v15  ;;  %v1480_v35 = vadd.f32 %v1479_v19, %v1319_v51 }
 0x197   : > { %v1687_v7 = vmin.f32 %v1655_v6, 255.0  ;;  %v1653_v29 = vmax.f32 %v2338_v60, 0.0  ;;  %v1488_v8 = vadd.f32 %v2295_v44, %v1327_v13  ;;  %v2236_v37 = vadd.f32 %v2235_v9, %v2234_v50 }
 0x198   : > { %v1775_v47 = vpack.c.f32.eXmY %v1713_v27, %v1714_v61, 56  ;;  %v1656_v18 = vmax.f32 %v2341_v5, 0.0  ;;  %v1558_v16 = vadd.f32 %v2817_v0, %v1519_v63  ;;  %v1522_v38 = vmul.f32 7.468167e-05, %v1480_v35 }
 0x199   : > { %v1524_v14 = vmul.f32 7.468167e-05, %v1488_v8  ;;  %v1330_v33 = vadd.f32 %v2236_v37, %v2763_v34  ;;  %v1322_v24 = vadd.f32 %v2230_v41, %v2759_v22  ;;  %v1719_v39 = vtrunc.f32 %v1687_v7 }
 0x19a   : > { %v1783_v20 = vpack.c.b8 %v1779_v62, %v1775_v47  ;;  %v1688_v2 = vmin.f32 %v1656_v18, 255.0  ;;  %v2339_v28 = vround.rtne.f32 %v1558_v16  ;;  %v1561_v12 = vadd.f32 %v2817_v0, %v1522_v38 }
 0x19b   : > { %v1563_v49 = vadd.f32 %v2817_v0, %v1524_v14  ;;  %v1491_v17 = vadd.f32 %v2296_v1, %v1330_v33  ;;  %v1685_v25 = vmin.f32 %v1653_v29, 255.0  ;;  %v1483_v34 = vadd.f32 %v1482_v59, %v1322_v24 }
 0x19c   : > { %1810 = vst.msk [vmem:[%s2856_s22 + $0x28] sm:$0xff] %vm962_vm0, %v1783_v20  ;;  %v1720_v48 = vtrunc.f32 %v1688_v2  ;;  %v1654_v4 = vmax.f32 %v2339_v28, 0.0  ;;  %v2342_v42 = vround.rtne.f32 %v1561_v12 }
 0x19d   : > { %v2344_v54 = vround.rtne.f32 %v1563_v49  ;;  %v1525_v26 = vmul.f32 7.468167e-05, %v1491_v17  ;;  %v1523_v27 = vmul.f32 7.468167e-05, %v1483_v34  ;;  %v1717_v31 = vtrunc.f32 %v1685_v25 }
 0x19e   : > { %v1789_v45 = vpack.c.f32.eXmY %v1719_v39, %v1720_v48, 56  ;;  %v1686_v36 = vmin.f32 %v1654_v4, 255.0  ;;  %v1657_v22 = vmax.f32 %v2342_v42, 0.0 }
 0x19f   : > { %v1659_v40 = vmax.f32 %v2344_v54, 0.0  ;;  %v1564_v23 = vadd.f32 %v2817_v0, %v1525_v26  ;;  %v1562_v56 = vadd.f32 %v2817_v0, %v1523_v27 }
 0x1a0   : > { %v1718_v21 = vtrunc.f32 %v1686_v36  ;;  %v1689_v10 = vmin.f32 %v1657_v22, 255.0 }
 0x1a1   : > { %v2345_v41 = vround.rtne.f32 %v1564_v23  ;;  %v1691_v44 = vmin.f32 %v1659_v40, 255.0  ;;  %v2343_v30 = vround.rtne.f32 %v1562_v56 }
 0x1a2   : > { %v1785_v57 = vpack.c.f32.eXmY %v1717_v31, %v1718_v21, 56  ;;  %v1721_v43 = vtrunc.f32 %v1689_v10 }
 0x1a3   : > { %v1660_v46 = vmax.f32 %v2345_v41, 0.0  ;;  %v1658_v19 = vmax.f32 %v2343_v30, 0.0  ;;  %v1723_v55 = vtrunc.f32 %v1691_v44 }
 0x1a4   : > { %v1793_v53 = vpack.c.b8 %v1789_v45, %v1785_v57 }
 0x1a5   : > { %v1692_v58 = vmin.f32 %v1660_v46, 255.0  ;;  %v1690_v11 = vmin.f32 %v1658_v19, 255.0 }
 0x1a6   : > { %1811 = vst.msk [vmem:[%s2856_s22 + $0x30] sm:$0xff] %vm962_vm0, %v1793_v53 }
 0x1a7   : > { %v1724_v3 = vtrunc.f32 %v1692_v58  ;;  %v1722_v50 = vtrunc.f32 %v1690_v11 }
 0x1a9   : > { %v1799_v1 = vpack.c.f32.eXmY %v1723_v55, %v1724_v3, 56  ;;  %v1795_v32 = vpack.c.f32.eXmY %v1721_v43, %v1722_v50, 56 }
 0x1ab   : > { %v1803_v52 = vpack.c.b8 %v1799_v1, %v1795_v32 }
 0x1ad   : > { %1812 = vst.msk [vmem:[%s2856_s22 + $0x38] sm:$0xff] %vm962_vm0, %v1803_v52 }
 0x1ae PF: > { %s13_s12 = sadd.s32 1, %s2508_s12  }
 0x1af   : > { %p10_p5 = scmp.ge.s32.totalorder %s13_s12, 4  }
 0x1b1   :  { %12 = sbr.rel (!%p10_p5) target bundleno = 1 (0x1), region = 62 }

</bundles_post_ra>
